<compile_context>
chip_gen: v7x
topology: tpu7x:2x2x1
jax: 0.10.0
libtpu: 0.0.40
codegen_flags: <defaults>
</compile_context>

<pallas_src>
import functools

import jax
import jax.numpy as jnp
from jax.experimental import pallas as pl
from jax.experimental.pallas import tpu as pltpu


def _generator_kernel(zT_ref, w1T_ref, b1T_ref, w2T_ref, b2T_ref, oT_ref):
    # Hidden layer (transposed): (Hp, noise) @ (noise, TM) -> (Hp, TM), batch on lanes.
    h = jnp.dot(w1T_ref[...], zT_ref[...], preferred_element_type=jnp.float32)
    h = jnp.maximum(h + b1T_ref[...], 0.0)  # bias + ReLU in f32 on the VPU
    # Output layer (transposed): (out, Hp) @ (Hp, TM) -> (out, TM), lane-dense store.
    o = jnp.dot(w2T_ref[...], h, preferred_element_type=jnp.float32)
    oT_ref[...] = (o + b2T_ref[...]).astype(oT_ref.dtype)


@functools.partial(jax.jit, static_argnames=("tm",))
def generator_forward(z, w1, b1, w2, b2, *, tm=1024):
    """Forward pass of Generator.

    z : (B, noise_dim) float32, one sample per row.
    w1: (noise_dim, hidden), b1: (hidden,)   -> h = relu(z @ w1 + b1)
    w2: (hidden, out_dim),   b2: (out_dim,)  -> y = h @ w2 + b2
    Returns (B, out_dim) float32.
    """
    assert tm % 128 == 0
    B, noise_dim = z.shape
    hidden = w1.shape[1]
    out_dim = w2.shape[1]

    # --- pad hidden dim to a multiple of 128 (lane tile) with zeros -------------
    hidden_p = pl.cdiv(hidden, 128) * 128
    hpad = hidden_p - hidden
    w1p = jnp.pad(w1, ((0, 0), (0, hpad)))
    b1p = jnp.pad(b1.reshape(1, -1), ((0, 0), (0, hpad)))
    w2p = jnp.pad(w2, ((0, hpad), (0, 0)))

    # --- pad batch to a multiple of the row tile --------------------------------
    TM = min(tm, pl.cdiv(B, 128) * 128)
    B_p = pl.cdiv(B, TM) * TM
    zp = jnp.pad(z, ((0, B_p - B), (0, 0)))

    # --- transposed (features, batch) layout: batch on the lane axis ------------
    zT = zp.T                               # (noise_dim, B_p)
    w1T = w1p.T                             # (hidden_p, noise_dim)
    b1T = b1p.reshape(hidden_p, 1)          # (hidden_p, 1)
    w2T = w2p.T                             # (out_dim, hidden_p)
    b2T = b2.reshape(out_dim, 1)            # (out_dim, 1)

    grid = (B_p // TM,)
    bytes_accessed = 4 * (
        B_p * (noise_dim + out_dim)
        + hidden_p * noise_dim + hidden_p + out_dim * hidden_p + out_dim
    )
    out_T = pl.pallas_call(
        _generator_kernel,
        out_shape=jax.ShapeDtypeStruct((out_dim, B_p), z.dtype),
        grid=grid,
        in_specs=[
            pl.BlockSpec((noise_dim, TM), lambda i: (0, i)),       # z^T   (streamed)
            pl.BlockSpec((hidden_p, noise_dim), lambda i: (0, 0)),  # W1^T  (resident)
            pl.BlockSpec((hidden_p, 1), lambda i: (0, 0)),          # b1    (resident)
            pl.BlockSpec((out_dim, hidden_p), lambda i: (0, 0)),    # W2^T  (resident)
            pl.BlockSpec((out_dim, 1), lambda i: (0, 0)),           # b2    (resident)
        ],
        out_specs=pl.BlockSpec((out_dim, TM), lambda i: (0, i)),    # out^T (streamed)
        compiler_params=pltpu.CompilerParams(
            dimension_semantics=("parallel",),
        ),
        cost_estimate=pl.CostEstimate(
            flops=2 * B_p * hidden_p * (noise_dim + out_dim),
            transcendentals=0,
            bytes_accessed=bytes_accessed,
        ),
    )(zT, w1T, b1T, w2T, b2T)

    # Back to (B, out_dim) row-major samples; drop batch padding.
    return out_T.T[:B]


def init_generator_params(key, noise_dim=2, output_dim=2, hidden_dim=100):
    """PyTorch nn.Linear-style init: U[-1/sqrt(fan_in), 1/sqrt(fan_in)]."""
    k1, k2, k3, k4 = jax.random.split(key, 4)
    bound1 = 1.0 / jnp.sqrt(jnp.float32(noise_dim))
    bound2 = 1.0 / jnp.sqrt(jnp.float32(hidden_dim))
    w1 = jax.random.uniform(k1, (noise_dim, hidden_dim), jnp.float32, -bound1, bound1)
    b1 = jax.random.uniform(k2, (hidden_dim,), jnp.float32, -bound1, bound1)
    w2 = jax.random.uniform(k3, (hidden_dim, output_dim), jnp.float32, -bound2, bound2)
    b2 = jax.random.uniform(k4, (output_dim,), jnp.float32, -bound2, bound2)
    return w1, b1, w2, b2


if __name__ == "__main__":
    noise_dim, output_dim, hidden_dim = 2, 2, 100
    batch = 8

    key = jax.random.PRNGKey(0)
    kz, kp = jax.random.split(key)
    z = jax.random.normal(kz, (batch, noise_dim), dtype=jnp.float32)
    w1, b1, w2, b2 = init_generator_params(
        kp, noise_dim=noise_dim, output_dim=output_dim, hidden_dim=hidden_dim
    )

    out = generator_forward(z, w1, b1, w2, b2)
    out = jax.block_until_ready(out)

    # Pure-JAX reference check
    ref = jnp.maximum(z @ w1 + b1[None, :], 0.0) @ w2 + b2[None, :]
    assert out.shape == (batch, output_dim)
    assert jnp.allclose(out, ref, atol=1e-4, rtol=1e-4), (
        float(jnp.max(jnp.abs(out - ref)))
    )

    print("KERNEL_OK")
</pallas_src>

<mosaic_0001>
module attributes {stable_mosaic.version = 11 : i64} {
  func.func @_generator_kernel(%arg0: i32, %arg1: memref<2x128xf32, #tpu.memory_space<vmem>>, %arg2: memref<128x2xf32, #tpu.memory_space<vmem>>, %arg3: memref<128x1xf32, #tpu.memory_space<vmem>>, %arg4: memref<2x128xf32, #tpu.memory_space<vmem>>, %arg5: memref<2x1xf32, #tpu.memory_space<vmem>>, %arg6: memref<2x128xf32, #tpu.memory_space<vmem>>) attributes {dimension_semantics = [#tpu.dimension_semantics<parallel>], iteration_bounds = array<i64: 1>, scalar_prefetch = 0 : i64, scratch_operands = 0 : i64, tpu.core_type = #tpu.core_type<tc>, window_params = [{transform_indices = @transform_0, window_bounds = array<i64: 2, 128>}, {pipeline_mode = #tpu.pipeline_mode<synchronous>, transform_indices = @transform_1, window_bounds = array<i64: 128, 2>}, {pipeline_mode = #tpu.pipeline_mode<synchronous>, transform_indices = @transform_2, window_bounds = array<i64: 128, 1>}, {pipeline_mode = #tpu.pipeline_mode<synchronous>, transform_indices = @transform_3, window_bounds = array<i64: 2, 128>}, {pipeline_mode = #tpu.pipeline_mode<synchronous>, transform_indices = @transform_4, window_bounds = array<i64: 2, 1>}, {transform_indices = @transform_5, window_bounds = array<i64: 2, 128>}]} {
    %c0 = arith.constant 0 : index
    %c0_0 = arith.constant 0 : index
    %0 = vector.load %arg2[%c0, %c0_0] : memref<128x2xf32, #tpu.memory_space<vmem>>, vector<128x2xf32>
    %c0_1 = arith.constant 0 : index
    %c0_2 = arith.constant 0 : index
    %1 = vector.load %arg1[%c0_1, %c0_2] : memref<2x128xf32, #tpu.memory_space<vmem>>, vector<2x128xf32>
    %cst = arith.constant dense<0.000000e+00> : vector<128x128xf32>
    %2 = tpu.matmul %0, %1, %cst {dimension_numbers = #tpu.dot_dimension_numbers<[1], [0], [0], [1], [0, 0, 1, 1], [], []>} : vector<128x2xf32>, vector<2x128xf32>, vector<128x128xf32> -> vector<128x128xf32>
    %c0_3 = arith.constant 0 : index
    %c0_4 = arith.constant 0 : index
    %3 = vector.load %arg3[%c0_3, %c0_4] : memref<128x1xf32, #tpu.memory_space<vmem>>, vector<128x1xf32>
    %4 = vector.broadcast %3 : vector<128x1xf32> to vector<128x128xf32>
    %5 = arith.addf %2, %4 : vector<128x128xf32>
    %cst_5 = arith.constant 0.000000e+00 : f32
    %6 = vector.broadcast %cst_5 : f32 to vector<128x128xf32>
    %7 = arith.maximumf %5, %6 : vector<128x128xf32>
    %c0_6 = arith.constant 0 : index
    %c0_7 = arith.constant 0 : index
    %8 = vector.load %arg4[%c0_6, %c0_7] : memref<2x128xf32, #tpu.memory_space<vmem>>, vector<2x128xf32>
    %cst_8 = arith.constant dense<0.000000e+00> : vector<2x128xf32>
    %9 = tpu.matmul %8, %7, %cst_8 {dimension_numbers = #tpu.dot_dimension_numbers<[1], [0], [0], [1], [0, 0, 1, 1], [], []>} : vector<2x128xf32>, vector<128x128xf32>, vector<2x128xf32> -> vector<2x128xf32>
    %c0_9 = arith.constant 0 : index
    %c0_10 = arith.constant 0 : index
    %10 = vector.load %arg5[%c0_9, %c0_10] : memref<2x1xf32, #tpu.memory_space<vmem>>, vector<2x1xf32>
    %11 = vector.broadcast %10 : vector<2x1xf32> to vector<2x128xf32>
    %12 = arith.addf %9, %11 : vector<2x128xf32>
    %c0_11 = arith.constant 0 : index
    %c0_12 = arith.constant 0 : index
    %13 = vector.load %arg6[%c0_11, %c0_12] : memref<2x128xf32, #tpu.memory_space<vmem>>, vector<2x128xf32>
    tpu.vector_store %arg6[%c0_11, %c0_12], %12 {strides = array<i32>} : memref<2x128xf32, #tpu.memory_space<vmem>>, vector<2x128xf32>,
    return
  }
  func.func @transform_0(%arg0: i32) -> (i32, i32) {
    %c0_i32 = arith.constant 0 : i32
    %c0_i32_0 = arith.constant 0 : i32
    return %c0_i32, %arg0 : i32, i32
  }
  func.func @transform_1(%arg0: i32) -> (i32, i32) {
    %c0_i32 = arith.constant 0 : i32
    %c0_i32_0 = arith.constant 0 : i32
    %c0_i32_1 = arith.constant 0 : i32
    return %c0_i32, %c0_i32_0 : i32, i32
  }
  func.func @transform_2(%arg0: i32) -> (i32, i32) {
    %c0_i32 = arith.constant 0 : i32
    %c0_i32_0 = arith.constant 0 : i32
    %c0_i32_1 = arith.constant 0 : i32
    return %c0_i32, %c0_i32_0 : i32, i32
  }
  func.func @transform_3(%arg0: i32) -> (i32, i32) {
    %c0_i32 = arith.constant 0 : i32
    %c0_i32_0 = arith.constant 0 : i32
    %c0_i32_1 = arith.constant 0 : i32
    return %c0_i32, %c0_i32_0 : i32, i32
  }
  func.func @transform_4(%arg0: i32) -> (i32, i32) {
    %c0_i32 = arith.constant 0 : i32
    %c0_i32_0 = arith.constant 0 : i32
    %c0_i32_1 = arith.constant 0 : i32
    return %c0_i32, %c0_i32_0 : i32, i32
  }
  func.func @transform_5(%arg0: i32) -> (i32, i32) {
    %c0_i32 = arith.constant 0 : i32
    %c0_i32_0 = arith.constant 0 : i32
    return %c0_i32, %arg0 : i32, i32
  }
}

</mosaic_0001>

<bundles_post_ra>
// kernel: generator_forward.1
= control target key start
LH: loop header
LB: loop body
LE: loop exit
PB: predicated region body
PF: predicated region fallthrough
CT: control target
= control target key end

     0   :  { %vm183_vm0 = vcmask 1041408   ;;  %vm134_vm1 = vcmask 15360   ;;  %v607_v4 = vmov 0   ;;  %s783_s0 = inlined_call_operand.vmem [shape: f32[2,128], index: 0, kind: input, shape index: {}]   ;;  %s784_s1 = inlined_call_operand.vmem [shape: f32[128,2], index: 1, kind: input, shape index: {}]   ;;  %s785_s2 = inlined_call_operand.vmem [shape: f32[128,1], index: 2, kind: input, shape index: {}]   ;;  %s786_s3 = inlined_call_operand.vmem [shape: f32[2,128], index: 3, kind: input, shape index: {}]   ;;  %s787_s4 = inlined_call_operand.vmem [shape: f32[2,1], index: 4, kind: input, shape index: {}]   ;;  %s788_s5 = inlined_call_operand.hbm [shape: f32[2,128], index: 5, kind: output, shape index: {}]  }
   0x1   :  { %v37_v0 = vld [vmem:[%s783_s0] sm:$0x3]  ;;  %v22_v2 = vld [vmem:[%s784_s1 + $0x8] sm:$0xff]  ;;  %v23_v3 = vld [vmem:[%s784_s1 + $0x10] sm:$0xff]  ;;  %581 = vset.pattern.permute.xlu0 %v607_v4  ;;  %582 = vset.pattern.permute.xlu1 %v607_v4 }
   0x2   :  { %v21_v1 = vld [vmem:[%s784_s1] sm:$0xff]  ;;  %491 = vmatprep.subr.msk.mxu0 %vm183_vm0, %v37_v0  ;;  %v24_v5 = vld [vmem:[%s784_s1 + $0x18] sm:$0xff]  ;;  %v40_v8 = vld [vmem:[%s785_s2 + $0x10] sm:$0xff] }
   0x3   :  { %493 = vmatprep.mubr.msk.f32.mxu0 %vm134_vm1, %v21_v1  ;;  %492 = vmatpush3.msk.msra.mxu0 %vm183_vm0, %v37_v0  ;;  %v25_v6 = vld [vmem:[%s784_s1 + $0x20] sm:$0xff]  ;;  %v39_v9 = vld [vmem:[%s785_s2 + $0x8] sm:$0xff]  ;;  %v41_v11 = vld [vmem:[%s785_s2 + $0x18] sm:$0xff] }
   0x4   :  { %494 = vmatmul.mubr.msk.f32.vlgmr.msra.gmra.mrb[0].mxu0 %vm134_vm1, %v22_v2  ;;  %v38_v7 = vld [vmem:[%s785_s2] sm:$0xff]  ;;  %66 = vperm.xlu1 %582, %v40_v8   ;;  %v26_v10 = vld [vmem:[%s784_s1 + $0x28] sm:$0xff]  ;;  %v27_v12 = vld [vmem:[%s784_s1 + $0x30] sm:$0xff] }
   0x5   :  { %496 = vmatprep.mubr.msk.f32.mxu0 %vm134_vm1, %v23_v3  ;;  %56 = vperm.xlu0 %581, %v38_v7   ;;  %v42_v13 = vld [vmem:[%s785_s2 + $0x20] sm:$0xff] }
   0x8   :  { %497 = vmatmul.mubr.msk.f32.gmra.mrb[2].mxu0 %vm134_vm1, %v24_v5  ;;  %71 = vperm.xlu1 %582, %v41_v11  }
   0x9   :  { %499 = vmatprep.mubr.msk.f32.mxu0 %vm134_vm1, %v25_v6  ;;  %61 = vperm.xlu0 %581, %v39_v9  }
   0xc   :  { %500 = vmatmul.mubr.msk.f32.gmra.mrb[4].mxu0 %vm134_vm1, %v26_v10 }
   0xd   :  { %10 = vsyncpa [#allocation3], 0  ;;  %502 = vmatprep.mubr.msk.f32.mxu0 %vm134_vm1, %v27_v12  ;;  %v28_v14 = vld [vmem:[%s784_s1 + $0x38] sm:$0xff]  ;;  %v43_v15 = vld [vmem:[%s785_s2 + $0x28] sm:$0xff]  ;;  %76 = vperm.xlu0 %581, %v42_v13   ;;  %v608_v35 = vmov 0.0|0.0   ;;  %vm609_vm2 = vmmov 0  }
   0xe   :  { %v29_v16 = vld [vmem:[%s784_s1 + $0x40] sm:$0xff]  ;;  %v44_v17 = vld [vmem:[%s785_s2 + $0x30] sm:$0xff]  ;;  %81 = vperm.xlu1 %582, %v43_v15   ;;  %v30_v18 = vld [vmem:[%s784_s1 + $0x48] sm:$0xff]  ;;  %552 = vmatprep.subr.bf16.mxu1 %v608_v35  ;;  %v610_v36 = vmov 0.0  }
   0xf   :  { %v45_v19 = vld [vmem:[%s785_s2 + $0x38] sm:$0xff]  ;;  %v31_v20 = vld [vmem:[%s784_s1 + $0x50] sm:$0xff]  ;;  %v46_v21 = vld [vmem:[%s785_s2 + $0x40] sm:$0xff]  ;;  %549 = vmatprep.mubr.msk.f32.mxu1 %vm609_vm2, %v610_v36 }
  0x10   :  { %503 = vmatmul.mubr.msk.f32.gmra.mrb[6].mxu0 %vm134_vm1, %v28_v14  ;;  %v32_v22 = vld [vmem:[%s784_s1 + $0x58] sm:$0xff]  ;;  %v47_v23 = vld [vmem:[%s785_s2 + $0x48] sm:$0xff]  ;;  %v33_v24 = vld [vmem:[%s784_s1 + $0x60] sm:$0xff] }
  0x11   :  { %505 = vmatprep.mubr.msk.f32.mxu0 %vm134_vm1, %v29_v16  ;;  %86 = vperm.xlu0 %581, %v44_v17   ;;  %v48_v25 = vld [vmem:[%s785_s2 + $0x50] sm:$0xff]  ;;  %v34_v26 = vld [vmem:[%s784_s1 + $0x68] sm:$0xff]  ;;  %v49_v27 = vld [vmem:[%s785_s2 + $0x58] sm:$0xff] }
  0x12   :  { %91 = vperm.xlu1 %582, %v45_v19   ;;  %v35_v28 = vld [vmem:[%s784_s1 + $0x70] sm:$0xff]  ;;  %v50_v29 = vld [vmem:[%s785_s2 + $0x60] sm:$0xff]  ;;  %v36_v30 = vld [vmem:[%s784_s1 + $0x78] sm:$0xff] }
  0x13   :  { %v51_v31 = vld [vmem:[%s785_s2 + $0x68] sm:$0xff]  ;;  %v52_v32 = vld [vmem:[%s785_s2 + $0x70] sm:$0xff]  ;;  %v53_v33 = vld [vmem:[%s785_s2 + $0x78] sm:$0xff] }
  0x14   :  { %506 = vmatmul.mubr.msk.f32.gmra.mrb[8].mxu0 %vm134_vm1, %v30_v18  ;;  %v349_v34 = vld [vmem:[%s787_s4] sm:$0x3]  ;;  %s611_s4 = smov [#allocation2]  }
  0x15   :  { %508 = vmatprep.mubr.msk.f32.mxu0 %vm134_vm1, %v31_v20  ;;  %96 = vperm.xlu0 %581, %v46_v21   ;;  %s432_s8 = sshll.u32 %s611_s4, 4  ;;  %s433_s8 = int_to_ptr.vmem [resolvable:$true] %s432_s8 }
  0x16   :  { %101 = vperm.xlu1 %582, %v47_v23   ;;  %s583_s9 = scalar_lea.vmem %s433_s8, 32  ;;  %p588_p1 = scmp.lt.s32.totalorder %s433_s8, %s433_s8 }
  0x17   :  { %p584_p0 = scmp.ne.s32.totalorder %s433_s8, %s583_s9  ;;  %p589_p2 = scmp.lt.s32.totalorder %s583_s9, %s583_s9 }
  0x18   :  { %509 = vmatmul.mubr.msk.f32.gmra.mrb[10].mxu0 %vm134_vm1, %v32_v22 }
  0x19   :  { %511 = vmatprep.mubr.msk.f32.mxu0 %vm134_vm1, %v33_v24  ;;  %106 = vperm.xlu0 %581, %v48_v25   ;;  %p590_p3 = por %p589_p2, %p588_p1 }
  0x1a   :  { %111 = vperm.xlu1 %582, %v49_v27  }
  0x1b   :  { %p591_p4 = pnand %p590_p3, %p584_p0 }
  0x1c   :  { %512 = vmatmul.mubr.msk.f32.gmra.mrb[12].mxu0 %vm134_vm1, %v34_v26 }
  0x1d   :  { %514 = vmatprep.mubr.msk.f32.mxu0 %vm134_vm1, %v35_v28  ;;  %116 = vperm.xlu0 %581, %v50_v29  }
  0x1e   :  { %121 = vperm.xlu1 %582, %v51_v31  }
  0x20   :  { %515 = vmatmul.mubr.msk.f32.gmra.mrb[14].mxu0 %vm134_vm1, %v36_v30 }
  0x21   :  { %126 = vperm.xlu0 %581, %v52_v32  }
  0x22   :  { %131 = vperm.xlu1 %582, %v53_v33  }
  0x25   :  { %352 = vperm.xlu0 %581, %v349_v34  }
  0x83   :  { %v67_v37 = vpop.permute.xlu1 %66 }
  0x84   :  { %v57_v38 = vpop.permute.xlu0 %56 }
  0x87   :  { %v72_v39 = vpop.permute.xlu1 %71 }
  0x88   :  { %v62_v40 = vpop.permute.xlu0 %61 }
  0x8c   :  { %v77_v42 = vpop.permute.xlu0 %76 }
  0x8d   :  { %v82_v41 = vpop.permute.xlu1 %81 }
  0x90   :  { %v87_v51 = vpop.permute.xlu0 %86 }
  0x91   :  { %v92_v48 = vpop.permute.xlu1 %91 }
  0x94   :  { %v97_v0 = vpop.permute.xlu0 %96 }
  0x95   :  { %v102_v61 = vpop.permute.xlu1 %101 }
  0x98   :  { %v107_v12 = vpop.permute.xlu0 %106 }
  0x99   :  { %v112_v9 = vpop.permute.xlu1 %111 }
  0x9c   :  { %v117_v25 = vpop.permute.xlu0 %116 }
  0x9d   :  { %v122_v22 = vpop.permute.xlu1 %121 }
  0xa1   :  { %v132_v34 = vpop.permute.xlu1 %131 }
  0xd7   :  { %v495_v43 = vpop.f32.mrb[0].mxu0 }
  0xd8   :  { %v259_v44 = vadd.f32 %v495_v43, %v62_v40  ;;  %v253_v45 = vpop.f32.mrb[1].mxu0 }
  0xd9   :  { %v254_v46 = vadd.f32 %v253_v45, %v57_v38  ;;  %v127_v38 = vpop.permute.xlu0 %126 }
  0xda   :  { %v333_v47 = vmax.f32 %v259_v44, 0.0 }
  0xdb   :  { %v332_v49 = vmax.f32 %v254_v46, 0.0  ;;  %v498_v50 = vpop.f32.mrb[2].mxu0  ;;  %v348_v46 = vld [vmem:[%s786_s3] sm:$0x3] }
  0xdc   :  { %v269_v52 = vadd.f32 %v498_v50, %v72_v39  ;;  %v263_v53 = vpop.f32.mrb[3].mxu0 }
  0xdd   :  { %v264_v54 = vadd.f32 %v263_v53, %v67_v37  ;;  %v553_v55 = vpack.c.bf16 %v333_v47, %v332_v49  ;;  %v353_v47 = vpop.permute.xlu0 %352 }
  0xde   :  { %v335_v56 = vmax.f32 %v269_v52, 0.0 }
  0xdf   :  { %v334_v57 = vmax.f32 %v264_v54, 0.0  ;;  %v501_v58 = vpop.f32.mrb[4].mxu0  ;;  %554 = vmatpush3.bf16.msra.mxu1 %v553_v55 }
  0xe0   :  { %v279_v59 = vadd.f32 %v501_v58, %v82_v41  ;;  %v273_v60 = vpop.f32.mrb[5].mxu0  ;;  %555 = vmatprep.subr.bf16.mxu1 %v608_v35 }
  0xe1   :  { %v556_v62 = vpack.c.bf16 %v335_v56, %v334_v57  ;;  %v274_v63 = vadd.f32 %v273_v60, %v77_v42 }
  0xe2   :  { %v337_v1 = vmax.f32 %v279_v59, 0.0 }
  0xe3   :  { %v336_v2 = vmax.f32 %v274_v63, 0.0  ;;  %v504_v3 = vpop.f32.mrb[6].mxu0  ;;  %557 = vmatpush3.bf16.msra.mxu1 %v556_v62 }
  0xe4   :  { %v289_v4 = vadd.f32 %v504_v3, %v92_v48  ;;  %v283_v5 = vpop.f32.mrb[7].mxu0  ;;  %558 = vmatprep.subr.bf16.mxu1 %v608_v35 }
  0xe5   :  { %v559_v6 = vpack.c.bf16 %v337_v1, %v336_v2  ;;  %v284_v7 = vadd.f32 %v283_v5, %v87_v51 }
  0xe6   :  { %v339_v8 = vmax.f32 %v289_v4, 0.0 }
  0xe7   :  { %v338_v10 = vmax.f32 %v284_v7, 0.0  ;;  %v507_v11 = vpop.f32.mrb[8].mxu0  ;;  %560 = vmatpush3.bf16.msra.mxu1 %v559_v6 }
  0xe8   :  { %v299_v13 = vadd.f32 %v507_v11, %v102_v61  ;;  %v293_v14 = vpop.f32.mrb[9].mxu0  ;;  %561 = vmatprep.subr.bf16.mxu1 %v608_v35 }
  0xe9   :  { %v562_v15 = vpack.c.bf16 %v339_v8, %v338_v10  ;;  %v294_v16 = vadd.f32 %v293_v14, %v97_v0 }
  0xea   :  { %v341_v17 = vmax.f32 %v299_v13, 0.0 }
  0xeb   :  { %v340_v18 = vmax.f32 %v294_v16, 0.0  ;;  %v510_v19 = vpop.f32.mrb[10].mxu0  ;;  %563 = vmatpush3.bf16.msra.mxu1 %v562_v15 }
  0xec   :  { %v309_v20 = vadd.f32 %v510_v19, %v112_v9  ;;  %v303_v21 = vpop.f32.mrb[11].mxu0  ;;  %564 = vmatprep.subr.bf16.mxu1 %v608_v35 }
  0xed   :  { %v565_v23 = vpack.c.bf16 %v341_v17, %v340_v18  ;;  %v304_v24 = vadd.f32 %v303_v21, %v107_v12 }
  0xee   :  { %v343_v26 = vmax.f32 %v309_v20, 0.0 }
  0xef   :  { %v342_v27 = vmax.f32 %v304_v24, 0.0  ;;  %v513_v28 = vpop.f32.mrb[12].mxu0  ;;  %566 = vmatpush3.bf16.msra.mxu1 %v565_v23 }
  0xf0   :  { %v319_v29 = vadd.f32 %v513_v28, %v122_v22  ;;  %v313_v30 = vpop.f32.mrb[13].mxu0  ;;  %567 = vmatprep.subr.bf16.mxu1 %v608_v35 }
  0xf1   :  { %v568_v31 = vpack.c.bf16 %v343_v26, %v342_v27  ;;  %v314_v32 = vadd.f32 %v313_v30, %v117_v25 }
  0xf2   :  { %v345_v33 = vmax.f32 %v319_v29, 0.0 }
  0xf3   :  { %v344_v36 = vmax.f32 %v314_v32, 0.0  ;;  %v516_v37 = vpop.f32.mrb[14].mxu0  ;;  %569 = vmatpush3.bf16.msra.mxu1 %v568_v31 }
  0xf4   :  { %v329_v39 = vadd.f32 %v516_v37, %v132_v34  ;;  %v323_v40 = vpop.f32.mrb[15].mxu0  ;;  %570 = vmatprep.subr.bf16.mxu1 %v608_v35 }
  0xf5   :  { %v571_v41 = vpack.c.bf16 %v345_v33, %v344_v36  ;;  %v324_v42 = vadd.f32 %v323_v40, %v127_v38 }
  0xf6   :  { %v347_v43 = vmax.f32 %v329_v39, 0.0 }
  0xf7   :  { %v346_v44 = vmax.f32 %v324_v42, 0.0  ;;  %572 = vmatpush3.bf16.msra.mxu1 %v571_v41 }
  0xf8   :  { %573 = vmatprep.subr.bf16.mxu1 %v608_v35 }
  0xf9   :  { %v574_v45 = vpack.c.bf16 %v347_v43, %v346_v44 }
  0xfb   :  { %575 = vmatpush3.bf16.msra.mxu1 %v574_v45 }
  0xfe   :  { %550 = vmatmul.mubr.f32.vlgmr.msra.gmra.mrb[0].mxu1 %v348_v46 }
 0x1d1   :  { %v421_v48 = vpop.f32.mrb[0].mxu1 }
 0x1d2   :  { %v422_v49 = vadd.f32 %v421_v48, %v353_v47  ;;  %v551_v50 = vpop.f32.mrb[1].mxu1 }
 0x1d4   :  { %425 = vst [vmem:[#allocation2] sm:$0x3] %v422_v49 }
 0x1d5   :  { %594 = shalt.err (!%p591_p4)
}
 0x1d6   :  { %s595_s3 = scalar_lea.hbm %s788_s5, 32 }
 0x1d7   :  { %p596_p5 = scmp.ne.s32.totalorder %s788_s5, %s595_s3  ;;  %p599_p6 = scmp.lt.u32.totalorder %s595_s3, %s788_s5 }
 0x1d9   :  { %p601_p7 = pnand %p599_p6, %p596_p5 }
 0x1db   :  { %604 = shalt.err (!%p601_p7)
}
 0x1dc   :  { %435 = dma.vmem_to_hbm [thread:$0]  %s433_s8, 32, %s788_s5, [#allocation3]  }
 0x1dd   :  { %605 = dma.done.wait [#allocation3], 32  }
 0x1de   :  { %606 = vsyncadd [#allocation3], 4294967264 }
 0x1df   :  { %439 = vsyncpa [#allocation3], 1 }

</bundles_post_ra>
